<compile_context>
chip_gen: v6e
topology: v6e:2x2x1
jax: 0.10.0
libtpu: 0.0.40
codegen_flags: <defaults>
</compile_context>

<pallas_src>
import functools

import jax
import jax.numpy as jnp
from jax import lax
from jax.experimental import pallas as pl
from jax.experimental.pallas import tpu as pltpu


def _cdiv(a, b):
    return (a + b - 1) // b


def _round_up(n, m):
    return _cdiv(n, m) * m


def snake_ann_kernel(x_ref, w1_ref, b1_ref, w2_ref, b2_ref, oT_ref):
    # x : (TB, input_size) f32      w1: (50, input_size) bf16   b1: (50, 1) f32
    # w2: (3, 50) f32               b2: (3, 1) f32              oT: (3, TB) f32
    x = x_ref[...].astype(jnp.bfloat16)          # cast in-kernel; VPU slot is free

    # First linear + ReLU.  Contract last dims: (50, in) x (TB, in)^T -> (50, TB),
    # f32 accumulation on the MXU.  Batch lands on the lane axis.
    h = lax.dot_general(
        w1_ref[...], x,
        dimension_numbers=(((1,), (1,)), ((), ())),
        preferred_element_type=jnp.float32,
    ) + b1_ref[...]
    h = jnp.maximum(h, 0.0)

    # Second linear.  (3, 50) @ (50, TB) -> (3, TB).  Tiny; kept in f32.
    logits = jnp.dot(w2_ref[...], h, preferred_element_type=jnp.float32) + b2_ref[...]

    # Softmax over the class axis (sublane axis, size 3), numerically stable.
    # Exact division so rows sum to 1 (cost is invisible under the HBM bound).
    m = jnp.max(logits, axis=0, keepdims=True)
    e = jnp.exp(logits - m)
    denom = jnp.sum(e, axis=0, keepdims=True)
    oT_ref[...] = (e / denom).astype(oT_ref.dtype)


@functools.partial(jax.jit, static_argnames=("tb_max",))
def snake_ann_forward(field, params, *, tb_max=16384):
    """params = (w1 (50,in), b1 (50,), w2 (3,50), b2 (3,)) in PyTorch (out,in) layout."""
    w1, b1, w2, b2 = params
    hidden, input_size = w1.shape
    n_out = w2.shape[0]

    x = field.reshape(-1, input_size)            # == field.view(-1, input_size)
    batch = x.shape[0]

    # Batch tile on the lane axis of the output:
    #   * tiny batch  -> single full-batch block (block dims == array dims).
    #   * large batch -> multiple of 128, capped at tb_max, sized so the grid
    #     has >=2 steps (megacore sharding on v7x; no-op on v5e/v6e).
    if batch <= 128:
        tb = batch
    else:
        tb = min(tb_max, _round_up(_cdiv(batch, 2), 128))
    grid = _cdiv(batch, tb)

    oT = pl.pallas_call(
        snake_ann_kernel,
        out_shape=jax.ShapeDtypeStruct((n_out, batch), jnp.float32),
        grid_spec=pltpu.PrefetchScalarGridSpec(
            num_scalar_prefetch=0,
            grid=(grid,),
            in_specs=[
                pl.BlockSpec((tb, input_size), lambda i: (i, 0)),       # streamed x tile
                pl.BlockSpec((hidden, input_size), lambda i: (0, 0)),   # resident weights
                pl.BlockSpec((hidden, 1), lambda i: (0, 0)),
                pl.BlockSpec((n_out, hidden), lambda i: (0, 0)),
                pl.BlockSpec((n_out, 1), lambda i: (0, 0)),
            ],
            out_specs=pl.BlockSpec((n_out, tb), lambda i: (0, i)),      # lane-dense out
        ),
        compiler_params=pltpu.CompilerParams(
            dimension_semantics=("parallel",),   # megacore sharding on v7x
            vmem_limit_bytes=32 * 1024 * 1024,   # safe on v5e / v6e / v7x
        ),
    )(
        x,                                       # natural layout, f32, no prepass
        w1.astype(jnp.bfloat16),
        b1.reshape(hidden, 1).astype(jnp.float32),
        w2.astype(jnp.float32),
        b2.reshape(n_out, 1).astype(jnp.float32),
    )

    return oT.T                                  # (batch, 3)


def init_params(key, input_size, hidden=50, n_out=3):
    """Deterministic init mimicking nn.Linear (uniform +/- 1/sqrt(fan_in)),
    stored in PyTorch-native (out_features, in_features) layout."""
    k1, k2, k3, k4 = jax.random.split(key, 4)
    lim1 = 1.0 / jnp.sqrt(jnp.float32(input_size))
    lim2 = 1.0 / jnp.sqrt(jnp.float32(hidden))
    w1 = jax.random.uniform(k1, (hidden, input_size), jnp.float32, -lim1, lim1)
    b1 = jax.random.uniform(k2, (hidden,), jnp.float32, -lim1, lim1)
    w2 = jax.random.uniform(k3, (n_out, hidden), jnp.float32, -lim2, lim2)
    b2 = jax.random.uniform(k4, (n_out,), jnp.float32, -lim2, lim2)
    return w1, b1, w2, b2


def _reference(field, params, input_size):
    w1, b1, w2, b2 = params
    x = field.reshape(-1, input_size)
    return jax.nn.softmax(jnp.maximum(x @ w1.T + b1, 0.0) @ w2.T + b2, axis=1)


if __name__ == "__main__":
    key = jax.random.PRNGKey(0)
    k_param, k_field, k_field2 = jax.random.split(key, 3)

    input_size = 32          # SnakeANN(input_size=32)
    batch = 8                # 8 game-field observations

    params = init_params(k_param, input_size)
    field = jax.random.normal(k_field, (batch, input_size), jnp.float32)

    out = snake_ann_forward(field, params)
    out = jax.block_until_ready(out)

    ref = _reference(field, params, input_size)
    assert out.shape == (batch, 3)
    assert jnp.allclose(jnp.sum(out, axis=1), 1.0, atol=1e-4)
    # bf16 first matmul -> compare against the f32 reference with a loose bound.
    assert jnp.allclose(out, ref, atol=3e-2, rtol=3e-2)

    # Second, slightly larger check that exercises a multi-step grid with a
    # ragged last batch tile (tb=256, grid=2, last block only partially valid).
    batch2 = 300
    field2 = jax.random.normal(k_field2, (batch2, input_size), jnp.float32)
    out2 = jax.block_until_ready(snake_ann_forward(field2, params))
    ref2 = _reference(field2, params, input_size)
    assert out2.shape == (batch2, 3)
    assert jnp.allclose(jnp.sum(out2, axis=1), 1.0, atol=1e-4)
    assert jnp.allclose(out2, ref2, atol=3e-2, rtol=3e-2)

    print("KERNEL_OK")
</pallas_src>

<mosaic_0001>
module attributes {stable_mosaic.version = 11 : i64} {
  func.func @snake_ann_kernel(%arg0: i32, %arg1: memref<8x32xf32, #tpu.memory_space<vmem>>, %arg2: memref<50x32xbf16, #tpu.memory_space<vmem>>, %arg3: memref<50x1xf32, #tpu.memory_space<vmem>>, %arg4: memref<3x50xf32, #tpu.memory_space<vmem>>, %arg5: memref<3x1xf32, #tpu.memory_space<vmem>>, %arg6: memref<3x8xf32, #tpu.memory_space<vmem>>) attributes {dimension_semantics = [#tpu.dimension_semantics<parallel>], iteration_bounds = array<i64: 1>, scalar_prefetch = 0 : i64, scratch_operands = 0 : i64, tpu.core_type = #tpu.core_type<tc>, window_params = [{transform_indices = @transform_0, window_bounds = array<i64: 8, 32>}, {pipeline_mode = #tpu.pipeline_mode<synchronous>, transform_indices = @transform_1, window_bounds = array<i64: 50, 32>}, {pipeline_mode = #tpu.pipeline_mode<synchronous>, transform_indices = @transform_2, window_bounds = array<i64: 50, 1>}, {pipeline_mode = #tpu.pipeline_mode<synchronous>, transform_indices = @transform_3, window_bounds = array<i64: 3, 50>}, {pipeline_mode = #tpu.pipeline_mode<synchronous>, transform_indices = @transform_4, window_bounds = array<i64: 3, 1>}, {transform_indices = @transform_5, window_bounds = array<i64: 3, 8>}]} {
    %c0 = arith.constant 0 : index
    %c0_0 = arith.constant 0 : index
    %0 = vector.load %arg1[%c0, %c0_0] : memref<8x32xf32, #tpu.memory_space<vmem>>, vector<8x32xf32>
    %1 = arith.truncf %0 : vector<8x32xf32> to vector<8x32xbf16>
    %c0_1 = arith.constant 0 : index
    %c0_2 = arith.constant 0 : index
    %2 = vector.load %arg2[%c0_1, %c0_2] : memref<50x32xbf16, #tpu.memory_space<vmem>>, vector<50x32xbf16>
    %cst = arith.constant dense<0.000000e+00> : vector<50x8xf32>
    %3 = tpu.matmul %2, %1, %cst {dimension_numbers = #tpu.dot_dimension_numbers<[1], [1], [0], [0], [0, 0, 1, 0], [], []>} : vector<50x32xbf16>, vector<8x32xbf16>, vector<50x8xf32> -> vector<50x8xf32>
    %c0_3 = arith.constant 0 : index
    %c0_4 = arith.constant 0 : index
    %4 = vector.load %arg3[%c0_3, %c0_4] : memref<50x1xf32, #tpu.memory_space<vmem>>, vector<50x1xf32>
    %5 = vector.broadcast %4 : vector<50x1xf32> to vector<50x8xf32>
    %6 = arith.addf %3, %5 : vector<50x8xf32>
    %cst_5 = arith.constant 0.000000e+00 : f32
    %7 = vector.broadcast %cst_5 : f32 to vector<50x8xf32>
    %8 = arith.maximumf %6, %7 : vector<50x8xf32>
    %c0_6 = arith.constant 0 : index
    %c0_7 = arith.constant 0 : index
    %9 = vector.load %arg4[%c0_6, %c0_7] : memref<3x50xf32, #tpu.memory_space<vmem>>, vector<3x50xf32>
    %cst_8 = arith.constant dense<0.000000e+00> : vector<3x8xf32>
    %10 = tpu.matmul %9, %8, %cst_8 {dimension_numbers = #tpu.dot_dimension_numbers<[1], [0], [0], [1], [0, 0, 1, 1], [], []>} : vector<3x50xf32>, vector<50x8xf32>, vector<3x8xf32> -> vector<3x8xf32>
    %c0_9 = arith.constant 0 : index
    %c0_10 = arith.constant 0 : index
    %11 = vector.load %arg5[%c0_9, %c0_10] : memref<3x1xf32, #tpu.memory_space<vmem>>, vector<3x1xf32>
    %12 = vector.broadcast %11 : vector<3x1xf32> to vector<3x8xf32>
    %13 = arith.addf %10, %12 : vector<3x8xf32>
    %cst_11 = arith.constant dense<0xFF800000> : vector<8xf32>
    %14 = vector.multi_reduction <maximumf>, %13, %cst_11 [0] : vector<3x8xf32> to vector<8xf32>
    %15 = vector.shape_cast %14 : vector<8xf32> to vector<1x8xf32>
    %16 = vector.broadcast %15 : vector<1x8xf32> to vector<3x8xf32>
    %17 = arith.subf %13, %16 : vector<3x8xf32>
    %18 = math.exp %17 : vector<3x8xf32>
    %cst_12 = arith.constant dense<0.000000e+00> : vector<8xf32>
    %19 = vector.multi_reduction <add>, %18, %cst_12 [0] : vector<3x8xf32> to vector<8xf32>
    %20 = vector.shape_cast %19 : vector<8xf32> to vector<1x8xf32>
    %21 = vector.broadcast %20 : vector<1x8xf32> to vector<3x8xf32>
    %22 = arith.divf %18, %21 : vector<3x8xf32>
    %c0_13 = arith.constant 0 : index
    %c0_14 = arith.constant 0 : index
    %23 = vector.load %arg6[%c0_13, %c0_14] : memref<3x8xf32, #tpu.memory_space<vmem>>, vector<3x8xf32>
    tpu.vector_store %arg6[%c0_13, %c0_14], %22 {strides = array<i32>} : memref<3x8xf32, #tpu.memory_space<vmem>>, vector<3x8xf32>,
    return
  }
  func.func @transform_0(%arg0: i32) -> (i32, i32) {
    %c0_i32 = arith.constant 0 : i32
    %c0_i32_0 = arith.constant 0 : i32
    return %arg0, %c0_i32 : i32, i32
  }
  func.func @transform_1(%arg0: i32) -> (i32, i32) {
    %c0_i32 = arith.constant 0 : i32
    %c0_i32_0 = arith.constant 0 : i32
    %c0_i32_1 = arith.constant 0 : i32
    return %c0_i32, %c0_i32_0 : i32, i32
  }
  func.func @transform_2(%arg0: i32) -> (i32, i32) {
    %c0_i32 = arith.constant 0 : i32
    %c0_i32_0 = arith.constant 0 : i32
    %c0_i32_1 = arith.constant 0 : i32
    return %c0_i32, %c0_i32_0 : i32, i32
  }
  func.func @transform_3(%arg0: i32) -> (i32, i32) {
    %c0_i32 = arith.constant 0 : i32
    %c0_i32_0 = arith.constant 0 : i32
    %c0_i32_1 = arith.constant 0 : i32
    return %c0_i32, %c0_i32_0 : i32, i32
  }
  func.func @transform_4(%arg0: i32) -> (i32, i32) {
    %c0_i32 = arith.constant 0 : i32
    %c0_i32_0 = arith.constant 0 : i32
    %c0_i32_1 = arith.constant 0 : i32
    return %c0_i32, %c0_i32_0 : i32, i32
  }
  func.func @transform_5(%arg0: i32) -> (i32, i32) {
    %c0_i32 = arith.constant 0 : i32
    %c0_i32_0 = arith.constant 0 : i32
    return %c0_i32, %arg0 : i32, i32
  }
}

</mosaic_0001>

<bundles_post_ra>
// kernel: snake_ann_forward.1
= control target key start
LH: loop header
LB: loop body
LE: loop exit
PB: predicated region body
PF: predicated region fallthrough
CT: control target
= control target key end

     0   :  { %vm91_vm0 = vcmask 261120   ;;  %v385_v3 = vmov 0   ;;  %s473_s0 = inlined_call_operand.vmem [shape: f32[8,32], index: 0, kind: input, shape index: {}]   ;;  %s474_s1 = inlined_call_operand.vmem [shape: bf16[50,32], index: 1, kind: input, shape index: {}]   ;;  %s475_s2 = inlined_call_operand.vmem [shape: f32[50,1], index: 2, kind: input, shape index: {}]   ;;  %s476_s3 = inlined_call_operand.vmem [shape: f32[3,50], index: 3, kind: input, shape index: {}]   ;;  %s477_s4 = inlined_call_operand.vmem [shape: f32[3,1], index: 4, kind: input, shape index: {}]   ;;  %s478_s5 = inlined_call_operand.hbm [shape: f32[3,8], index: 5, kind: output, shape index: {}]  }
   0x1   :  { %v22_v0 = vld [vmem:[%s473_s0] sm:$0xff]  ;;  %353 = vset.pattern.permute.xlu0 %v385_v3  ;;  %354 = vset.pattern.permute.xlu1 %v385_v3  ;;  %v37_v5 = vld [vmem:[%s475_s2 + $0x30] sm:$0x3]  ;;  %v36_v7 = vld [vmem:[%s475_s2 + $0x28] sm:$0xff] }
   0x2   :  { %v23_v1 = vpack.c.bf16 %v22_v0, %v22_v0  ;;  %v355_v2 = vld [vmem:[%s474_s1] sm:$0xff]   ;;  %70 = vperm.xlu0 %353, %v37_v5   ;;  %v34_v8 = vld [vmem:[%s475_s2 + $0x18] sm:$0xff] }
   0x3   :  { %323 = vmatprep.mubr.msk.bf16.mxu0 %vm91_vm0, %v355_v2  ;;  %v35_v6 = vld [vmem:[%s475_s2 + $0x20] sm:$0xff] }
   0x4   :  { %348 = vmatprep.subr.msk.bf16.mxu0 %vm91_vm0, %v23_v1  ;;  %v105_v4 = vsel %vm91_vm0, %v23_v1, 0  ;;  %60 = vperm.xlu1 %354, %v35_v6  }
   0x5   :  { %322 = vmatpush3.bf16.xpose.msra.mxu0 %v105_v4 }
   0x6   :  { %10 = vsyncpa [#allocation3], 0  ;;  %v356_v9 = vld [vmem:[%s474_s1 + $0x8] sm:$0xff]   ;;  %v357_v10 = vld [vmem:[%s474_s1 + $0x10] sm:$0xff]   ;;  %65 = vperm.xlu0 %353, %v36_v7   ;;  %v386_v16 = vmov 0.0   ;;  %vm387_vm1 = vmmov 0  }
   0x7   :  { %v33_v11 = vld [vmem:[%s475_s2 + $0x10] sm:$0xff]  ;;  %v32_v12 = vld [vmem:[%s475_s2 + $0x8] sm:$0xff]  ;;  %v31_v13 = vld [vmem:[%s475_s2] sm:$0xff]  ;;  %331 = vmatprep.subr.mxu1 %v386_v16  ;;  %345 = vmatprep.mubr.msk.f32.mxu1 %vm387_vm1, %v386_v16  ;;  %vm189_vm2 = vcmask 1041408   ;;  %vm185_vm3 = vcmask 408576   ;;  %vm263_vm4 = vcmask 59392  }
   0x8   :  { %55 = vperm.xlu1 %354, %v34_v8   ;;  %v179_v14 = vld [vmem:[%s477_s4] sm:$0x7]  ;;  %v358_v15 = vld [vmem:[%s474_s1 + $0x18] ss:$0 sps:$4 sm:$0x11]  }
   0x9   :  { %v178_v46 = vld [vmem:[%s476_s3] sm:$0x7]  ;;  %s388_s3 = smov [#allocation2]  }
   0xa   :  { %50 = vperm.xlu0 %353, %v33_v11   ;;  %s290_s4 = sshll.u32 %s388_s3, 4  ;;  %s291_s4 = int_to_ptr.vmem [resolvable:$true] %s290_s4 }
   0xb   :  { %s363_s18 = scalar_lea.vmem %s291_s4, 64  ;;  %p368_p1 = scmp.lt.s32.totalorder %s291_s4, %s291_s4 }
   0xc   :  { %324 = vmatmul.mubr.msk.bf16.vlgmr.msra.gmra.mxu0 %vm91_vm0, %v356_v9  ;;  %45 = vperm.xlu1 %354, %v32_v12   ;;  %p364_p0 = scmp.ne.s32.totalorder %s291_s4, %s363_s18  ;;  %p369_p2 = scmp.lt.s32.totalorder %s363_s18, %s363_s18 }
   0xd   :  { %327 = vmatprep.mubr.msk.bf16.mxu0 %vm91_vm0, %v357_v10 }
   0xe   :  { %40 = vperm.xlu0 %353, %v31_v13   ;;  %p370_p3 = por %p369_p2, %p368_p1 }
  0x10   :  { %182 = vperm.xlu1 %354, %v179_v14   ;;  %p371_p4 = pnand %p370_p3, %p364_p0 }
  0x14   :  { %328 = vmatmul.mubr.msk.bf16.gmra.mxu0 %vm91_vm0, %v358_v15 }
  0x7d   :  { %v71_v18 = vpop.permute.xlu0 %70 }
  0x7f   :  { %v61_v21 = vpop.permute.xlu1 %60 }
  0x81   :  { %v66_v23 = vpop.permute.xlu0 %65 }
  0x83   :  { %v56_v28 = vpop.permute.xlu1 %55 }
  0x85   :  { %v51_v30 = vpop.permute.xlu0 %50 }
  0x87   :  { %v46_v36 = vpop.permute.xlu1 %45 }
  0x89   :  { %v41_v39 = vpop.permute.xlu0 %40 }
  0x8b   :  { %v183_v47 = vpop.permute.xlu1 %182 }
  0xcc   :  { %v325_v17 = vpop.f32.mrf.mxu0 }
  0xcd   :  { %v150_v37 = vadd.f32 %v325_v17, %v51_v30 }
  0xce   :  { %v141_v19 = vpop.f32.mrf.mxu0 }
  0xcf   :  { %v173_v42 = vmax.f32 %v150_v37, 0.0  ;;  %v142_v43 = vadd.f32 %v141_v19, %v41_v39 }
  0xd0   :  { %v326_v20 = vpop.f32.mrf.mxu0 }
  0xd1   :  { %v153_v34 = vadd.f32 %v326_v20, %v56_v28  ;;  %v171_v45 = vmax.f32 %v142_v43, 0.0 }
  0xd2   :  { %v144_v22 = vpop.f32.mrf.mxu0 }
  0xd3   :  { %v174_v40 = vmax.f32 %v153_v34, 0.0  ;;  %v145_v41 = vadd.f32 %v144_v22, %v46_v36 }
  0xd4   :  { %v329_v24 = vpop.f32.mrf.mxu0 }
  0xd5   :  { %v166_v25 = vadd.f32 %v329_v24, %v71_v18  ;;  %v172_v44 = vmax.f32 %v145_v41, 0.0 }
  0xd6   :  { %v157_v26 = vpop.f32.mrf.mxu0 }
  0xd7   :  { %v177_v27 = vmax.f32 %v166_v25, 0.0  ;;  %v158_v32 = vadd.f32 %v157_v26, %v61_v21 }
  0xd8   :  { %v330_v29 = vpop.f32.mrf.mxu0 }
  0xd9   :  { %332 = vmatpush3.msk.msra.mxu1 %vm189_vm2, %v177_v27  ;;  %v175_v38 = vmax.f32 %v158_v32, 0.0 }
  0xda   :  { %v160_v31 = vpop.f32.mrf.mxu0  ;;  %333 = vmatprep.subr.mxu1 %v386_v16 }
  0xdb   :  { %v161_v33 = vadd.f32 %v160_v31, %v66_v23 }
  0xdd   :  { %v176_v35 = vmax.f32 %v161_v33, 0.0 }
  0xdf   :  { %334 = vmatpush3.msra.mxu1 %v176_v35 }
  0xe0   :  { %335 = vmatprep.subr.mxu1 %v386_v16 }
  0xe1   :  { %336 = vmatpush3.msra.mxu1 %v175_v38 }
  0xe2   :  { %337 = vmatprep.subr.mxu1 %v386_v16 }
  0xe3   :  { %338 = vmatpush3.msra.mxu1 %v174_v40 }
  0xe4   :  { %339 = vmatprep.subr.mxu1 %v386_v16 }
  0xe5   :  { %340 = vmatpush3.msra.mxu1 %v173_v42 }
  0xe6   :  { %341 = vmatprep.subr.mxu1 %v386_v16 }
  0xe7   :  { %342 = vmatpush3.msra.mxu1 %v172_v44 }
  0xe8   :  { %343 = vmatprep.subr.mxu1 %v386_v16 }
  0xe9   :  { %344 = vmatpush3.msra.mxu1 %v171_v45 }
  0xea   :  { %346 = vmatmul.mubr.msk.f32.vlgmr.msra.gmra.mxu1 %vm185_vm3, %v178_v46 }
 0x1aa   :  { %v259_v48 = vpop.f32.mrf.mxu1 }
 0x1ab   :  { %v260_v49 = vadd.f32 %v259_v48, %v183_v47 }
 0x1ac   :  { %v347_v50 = vpop.f32.mrf.mxu1 }
 0x1ad   :  { %v264_v51 = vsel %vm263_vm4, %v260_v49, -inf }
 0x1ae   :  { %v265_v52 = vrot.slane %v264_v51, 4 }
 0x1b0   :  { %v266_v53 = vmax.f32 %v264_v51, %v265_v52 }
 0x1b2   :  { %v267_v54 = vrot.slane %v266_v53, 2 }
 0x1b4   :  { %v268_v55 = vmax.f32 %v266_v53, %v267_v54 }
 0x1b6   :  { %v269_v56 = vrot.slane %v268_v55, 1 }
 0x1b8   :  { %v270_v57 = vmax.f32 %v268_v55, %v269_v56 }
 0x1ba   :  { %v271_v58 = vsub.f32 %v260_v49, %v270_v57 }
 0x1bc   :  { %v272_v59 = vmul.f32 1.442695, %v271_v58 }
 0x1be   :  { %359 = vpow2.f32 %v272_v59 }
 0x1cb   :  { %v360_v60 = vpop.eup %359 }
 0x1cc   :  { %v274_v61 = vsel %vm263_vm4, %v360_v60, 0.0 }
 0x1cd   :  { %v275_v62 = vrot.slane %v274_v61, 4 }
 0x1cf   :  { %v276_v63 = vadd.f32 %v275_v62, %v274_v61 }
 0x1d1   :  { %v277_v0 = vrot.slane %v276_v63, 2 }
 0x1d3   :  { %v278_v1 = vadd.f32 %v277_v0, %v276_v63 }
 0x1d5   :  { %v279_v2 = vrot.slane %v278_v1, 1 }
 0x1d7   :  { %v280_v3 = vadd.f32 %v279_v2, %v278_v1 }
 0x1d9   :  { %361 = vrcp.f32 %v280_v3 }
 0x1e6   :  { %v362_v4 = vpop.eup %361 }
 0x1e7   :  { %v282_v5 = vmul.f32 %v362_v4, %v360_v60 }
 0x1e9   :  { %283 = vst.msk [vmem:[#allocation2] sm:$0x7] %vm263_vm4, %v282_v5 }
 0x1ea   :  { %374 = shalt.err (!%p371_p4)
}
 0x1eb   :  { %293 = dma.vmem_to_hbm [thread:$0]  %s291_s4, 64, %s478_s5, [#allocation3]  }
 0x1ec   :  { %383 = dma.done.wait [#allocation3], 64  }
 0x1ed   :  { %384 = vsyncadd [#allocation3], 4294967232 }
 0x1ee   :  { %297 = vsyncpa [#allocation3], 1 }

</bundles_post_ra>
